<compile_context>
chip_gen: v7x
topology: tpu7x:2x2x1
jax: 0.10.0
libtpu: 0.0.40
codegen_flags: <defaults>
</compile_context>

<pallas_src>
import functools

import jax
import jax.numpy as jnp
from jax.experimental import pallas as pl
from jax.experimental.pallas import tpu as pltpu


_LANE = 128
_MAX_LANE_TILE = 2048                 # big lane tiles -> lane-dense vst, fewer grid steps
_UNROLL_C_MAX = 32                    # running-scan path for C <= this
_VMEM_LIMIT = 32 * 1024 * 1024        # scoped VMEM request (fits v5e/v6e/v7x)
_BLOCK_BUDGET = 12 * 1024 * 1024      # budget for double-buffered in+out blocks


# ---------------------------------------------------------------------------
# Tiling helpers
# ---------------------------------------------------------------------------
def _choose_tiling(N, C, M, in_itemsize, out_cols, out_itemsize):
    """Pick (n_blk, lane_tile) so 2x(input block) + 2x(output block) fits budget."""
    m_pad = pl.cdiv(M, _LANE) * _LANE
    tile = min(_MAX_LANE_TILE, m_pad)
    # Block the batch: use the full N when small (block dim == array dim keeps
    # the (8,128) rule satisfied), otherwise 8 so the output block's
    # second-minor dim is a multiple of 8.
    n_blk = N if N <= 8 else 8

    def blk_bytes(nb, t):
        return 2 * nb * C * t * in_itemsize + 2 * nb * out_cols * t * out_itemsize

    while tile > _LANE and blk_bytes(n_blk, tile) > _BLOCK_BUDGET:
        tile -= _LANE
    return n_blk, tile


def _pad_ncm(x3, n_blk, tile):
    N, C, M = x3.shape
    N_pad = pl.cdiv(N, n_blk) * n_blk
    M_pad = pl.cdiv(M, tile) * tile
    if N_pad != N or M_pad != M:
        x3 = jnp.pad(x3, ((0, N_pad - N), (0, 0), (0, M_pad - M)))
    return x3, N_pad, M_pad


# ---------------------------------------------------------------------------
# ArgMax kernel (reduce over axis 1 of an (N, C, M) layout)
# ---------------------------------------------------------------------------
def _argmax_kernel(x_ref, o_ref):
    n, c, t = x_ref.shape
    is_float = jnp.issubdtype(x_ref.dtype, jnp.floating)

    if c <= _UNROLL_C_MAX:
        # Running max/argmax scan over the channel rows.  ~3 VPU ops per
        # element, no full-size iota, no second cross-sublane reduction.
        best = x_ref[:, 0, :]
        best_idx = jnp.zeros((n, t), dtype=jnp.int32)
        for i in range(1, c):
            row = x_ref[:, i, :]
            take = row > best
            if is_float:
                # Match torch/jnp: NaN counts as the maximum, first NaN wins.
                take = jnp.logical_or(
                    take, jnp.isnan(row) & jnp.logical_not(jnp.isnan(best)))
            best = jnp.where(take, row, best)
            best_idx = jnp.where(take, jnp.int32(i), best_idx)
        o_ref[...] = best_idx
    else:
        # Two-pass fallback for very large channel counts; iota is (1, C, T)
        # so it broadcasts over the batch block instead of materializing it.
        x = x_ref[...]
        m = jnp.max(x, axis=1, keepdims=True)
        hit = x == m
        if is_float:
            hit = jnp.logical_or(hit, jnp.isnan(x))   # NaN max -> pick first NaN
        idx = jax.lax.broadcasted_iota(jnp.int32, (1, c, t), 1)
        masked = jnp.where(hit, idx, jnp.int32(c))
        o_ref[...] = jnp.min(masked, axis=1)


def _argmax_over_axis1(x3):
    """x3: (N, C, M) -> int32 (N, M), argmax over axis 1, via Pallas."""
    N, C, M = x3.shape
    n_blk, tile = _choose_tiling(N, C, M, x3.dtype.itemsize, 1, 4)
    x3, N_pad, M_pad = _pad_ncm(x3, n_blk, tile)
    grid = (N_pad // n_blk, M_pad // tile)
    out = pl.pallas_call(
        _argmax_kernel,
        out_shape=jax.ShapeDtypeStruct((N_pad, M_pad), jnp.int32),
        grid=grid,
        in_specs=[pl.BlockSpec((n_blk, C, tile), lambda i, j: (i, 0, j))],
        out_specs=pl.BlockSpec((n_blk, tile), lambda i, j: (i, j)),
        compiler_params=pltpu.CompilerParams(
            dimension_semantics=("parallel", "parallel"),
            vmem_limit_bytes=_VMEM_LIMIT,
        ),
    )(x3)
    return out[:N, :M]


# ---------------------------------------------------------------------------
# Softmax / LogSoftmax kernel (over axis 1 of an (N, C, M) layout)
# ---------------------------------------------------------------------------
def _softmax_kernel(log, x_ref, o_ref):
    x = x_ref[...].astype(jnp.float32)
    m = jnp.max(x, axis=1, keepdims=True)
    z = x - m
    e = jnp.exp(z)
    s = jnp.sum(e, axis=1, keepdims=True)
    if log:
        o_ref[...] = (z - jnp.log(s)).astype(o_ref.dtype)
    else:
        o_ref[...] = (e / s).astype(o_ref.dtype)


def _softmax_over_axis1(x3, log=False):
    N, C, M = x3.shape
    itemsize = x3.dtype.itemsize
    n_blk, tile = _choose_tiling(N, C, M, itemsize, C, itemsize)
    x3, N_pad, M_pad = _pad_ncm(x3, n_blk, tile)
    grid = (N_pad // n_blk, M_pad // tile)
    out = pl.pallas_call(
        functools.partial(_softmax_kernel, log),
        out_shape=jax.ShapeDtypeStruct((N_pad, C, M_pad), x3.dtype),
        grid=grid,
        in_specs=[pl.BlockSpec((n_blk, C, tile), lambda i, j: (i, 0, j))],
        out_specs=pl.BlockSpec((n_blk, C, tile), lambda i, j: (i, 0, j)),
        compiler_params=pltpu.CompilerParams(
            dimension_semantics=("parallel", "parallel"),
            vmem_limit_bytes=_VMEM_LIMIT,
        ),
    )(x3)
    return out[:N, :, :M]


# ---------------------------------------------------------------------------
# Elementwise kernel (sigmoid / tanh / clamp)
# ---------------------------------------------------------------------------
def _elementwise_kernel(fn, x_ref, o_ref):
    o_ref[...] = fn(x_ref[...]).astype(o_ref.dtype)


def _elementwise(x, fn):
    shape = x.shape
    flat = x.reshape(-1)
    L = flat.shape[0]
    cols = min(1024, pl.cdiv(max(L, 1), _LANE) * _LANE)
    rows = pl.cdiv(max(L, 1), cols)
    rblk = rows if rows <= 512 else 512
    rows_pad = pl.cdiv(rows, rblk) * rblk
    L_pad = rows_pad * cols
    if L_pad != L:
        flat = jnp.pad(flat, (0, L_pad - L))
    x2 = flat.reshape(rows_pad, cols)
    out = pl.pallas_call(
        functools.partial(_elementwise_kernel, fn),
        out_shape=jax.ShapeDtypeStruct((rows_pad, cols), x.dtype),
        grid=(rows_pad // rblk,),
        in_specs=[pl.BlockSpec((rblk, cols), lambda i: (i, 0))],
        out_specs=pl.BlockSpec((rblk, cols), lambda i: (i, 0)),
        compiler_params=pltpu.CompilerParams(
            dimension_semantics=("parallel",),
            vmem_limit_bytes=_VMEM_LIMIT,
        ),
    )(x2)
    return out.reshape(-1)[:L].reshape(shape)


# ---------------------------------------------------------------------------
# Module-level classes (JAX/Pallas ports, forward pass only)
# ---------------------------------------------------------------------------
def _flatten_trailing(shape):
    m = 1
    for s in shape:
        m *= s
    return m


class ArgMax:
    """torch.argmax(x, dim) — returns int32 indices."""

    def __init__(self, dim=None):
        self.dim = dim

    def __call__(self, x):
        if self.dim is None:
            # TODO(synk): global (flattened) argmax has no lane-friendly
            # single-pass tiling here; fall back to plain jnp for that case.
            return jnp.argmax(x)
        dim = self.dim % x.ndim
        if x.ndim == 1:
            return _argmax_over_axis1(x.reshape(1, x.shape[0], 1)).reshape(())
        xm = jnp.moveaxis(x, dim, 1)
        lead = xm.shape[:1]
        c = xm.shape[1]
        rest = xm.shape[2:]
        x3 = xm.reshape(lead[0], c, _flatten_trailing(rest))
        out = _argmax_over_axis1(x3)
        return out.reshape(lead + rest)


class Softmax:
    """nn.Softmax / nn.LogSoftmax over `dim` (torch legacy default dim rules)."""

    def __init__(self, dim=None, log=False):
        self.dim = dim
        self.log = log

    def __call__(self, x):
        dim = self.dim
        if dim is None:
            dim = 0 if x.ndim in (0, 1, 3) else 1   # torch legacy default
        dim = dim % x.ndim
        if x.ndim == 1:
            return _softmax_over_axis1(x.reshape(1, -1, 1), log=self.log).reshape(x.shape)
        xm = jnp.moveaxis(x, dim, 1)
        n, c = xm.shape[0], xm.shape[1]
        rest = xm.shape[2:]
        y3 = _softmax_over_axis1(xm.reshape(n, c, _flatten_trailing(rest)), log=self.log)
        ym = y3.reshape((n, c) + rest)
        return jnp.moveaxis(ym, 1, dim)


class Clamp:
    def __init__(self, min=0, max=1):
        self.min, self.max = (min, max)

    def __call__(self, x):
        lo, hi = self.min, self.max
        return _elementwise(x, lambda v: jnp.clip(v, lo, hi))


class Activation:
    """JAX/Pallas port of the PyTorch Activation module (forward only)."""

    def __init__(self, name, **params):
        if name is None or name == 'identity':
            self.activation = lambda x: x
        elif name == 'sigmoid':
            self.activation = lambda x: _elementwise(x, jax.nn.sigmoid)
        elif name == 'softmax2d':
            self.activation = Softmax(dim=1, **params)
        elif name == 'softmax':
            self.activation = Softmax(**params)
        elif name == 'logsoftmax':
            self.activation = Softmax(log=True, **params)
        elif name == 'tanh':
            self.activation = lambda x: _elementwise(x, jnp.tanh)
        elif name == 'argmax':
            self.activation = ArgMax(**params)
        elif name == 'argmax2d':
            self.activation = ArgMax(dim=1, **params)
        elif name == 'clamp':
            self.activation = Clamp(**params)
        elif callable(name):
            self.activation = name(**params)
        else:
            raise ValueError(
                'Activation should be callable/sigmoid/softmax/logsoftmax/'
                f'tanh/argmax/argmax2d/clamp/None; got {name}')

    def __call__(self, x):
        return self.activation(x)


# ---------------------------------------------------------------------------
if __name__ == "__main__":
    key = jax.random.PRNGKey(0)
    k1, k2, k3 = jax.random.split(key, 3)

    # NCHW input, small shapes: batch=2, channels=4, spatial=16x16.
    x = jax.random.normal(k1, (2, 4, 16, 16), dtype=jnp.float32)

    # argmax2d (class-channel argmax, the common decoder path)
    y = jax.block_until_ready(Activation('argmax2d')(x))
    ref = jnp.argmax(x, axis=1).astype(jnp.int32)
    assert y.shape == ref.shape and y.dtype == jnp.int32, (y.shape, y.dtype)
    assert bool(jnp.all(y == ref)), "Pallas argmax2d mismatch vs jnp.argmax"

    # ragged spatial extent (7x7 = 49 lanes, not a multiple of 128) + odd batch
    x2 = jax.random.normal(k2, (3, 5, 7, 7), dtype=jnp.float32)
    y2 = jax.block_until_ready(Activation('argmax2d')(x2))
    assert bool(jnp.all(y2 == jnp.argmax(x2, axis=1).astype(jnp.int32)))

    # argmax along the last dim
    x3 = jax.random.normal(k3, (2, 8, 32), dtype=jnp.float32)
    y3 = jax.block_until_ready(Activation('argmax', dim=-1)(x3))
    assert bool(jnp.all(y3 == jnp.argmax(x3, axis=-1).astype(jnp.int32)))

    # elementwise activations
    ys = jax.block_until_ready(Activation('sigmoid')(x))
    assert bool(jnp.allclose(ys, jax.nn.sigmoid(x), rtol=1e-5, atol=1e-6))
    yt = jax.block_until_ready(Activation('tanh')(x))
    assert bool(jnp.allclose(yt, jnp.tanh(x), rtol=1e-5, atol=1e-6))
    yc = jax.block_until_ready(Activation('clamp', min=-0.5, max=0.5)(x))
    assert bool(jnp.allclose(yc, jnp.clip(x, -0.5, 0.5)))

    # softmax2d / logsoftmax
    ysm = jax.block_until_ready(Activation('softmax2d')(x))
    assert bool(jnp.allclose(ysm, jax.nn.softmax(x, axis=1), rtol=1e-5, atol=1e-6))
    yls = jax.block_until_ready(Activation('logsoftmax', dim=1)(x))
    assert bool(jnp.allclose(yls, jax.nn.log_softmax(x, axis=1), rtol=1e-5, atol=1e-5))

    print("KERNEL_OK")
</pallas_src>

<mosaic_0001>
module attributes {stable_mosaic.version = 11 : i64} {
  func.func @_argmax_kernel(%arg0: i32, %arg1: i32, %arg2: memref<2x4x256xf32, #tpu.memory_space<vmem>>, %arg3: memref<2x256xi32, #tpu.memory_space<vmem>>) attributes {dimension_semantics = [#tpu.dimension_semantics<parallel>, #tpu.dimension_semantics<parallel>], iteration_bounds = array<i64: 1, 1>, scalar_prefetch = 0 : i64, scratch_operands = 0 : i64, tpu.core_type = #tpu.core_type<tc>, window_params = [{transform_indices = @transform_0, window_bounds = array<i64: 2, 4, 256>}, {transform_indices = @transform_1, window_bounds = array<i64: 2, 256>}]} {
    %c0 = arith.constant 0 : index
    %c0_0 = arith.constant 0 : index
    %c0_1 = arith.constant 0 : index
    %0 = vector.load %arg2[%c0, %c0_0, %c0_1] : memref<2x4x256xf32, #tpu.memory_space<vmem>>, vector<2x1x256xf32>
    %1 = vector.shape_cast %0 : vector<2x1x256xf32> to vector<2x256xf32>
    %c0_i32 = arith.constant 0 : i32
    %2 = vector.broadcast %c0_i32 : i32 to vector<2x256xi32>
    %c0_2 = arith.constant 0 : index
    %c1 = arith.constant 1 : index
    %c0_3 = arith.constant 0 : index
    %3 = vector.load %arg2[%c0_2, %c1, %c0_3] : memref<2x4x256xf32, #tpu.memory_space<vmem>>, vector<2x1x256xf32>
    %4 = vector.shape_cast %3 : vector<2x1x256xf32> to vector<2x256xf32>
    %5 = arith.cmpf ogt, %4, %1 : vector<2x256xf32>
    %6 = arith.cmpf one, %4, %4 : vector<2x256xf32>
    %7 = arith.cmpf one, %1, %1 : vector<2x256xf32>
    %cst = arith.constant dense<true> : vector<2x256xi1>
    %8 = arith.xori %7, %cst : vector<2x256xi1>
    %9 = arith.andi %6, %8 : vector<2x256xi1>
    %10 = arith.ori %5, %9 : vector<2x256xi1>
    %11 = arith.select %10, %4, %1 : vector<2x256xi1>, vector<2x256xf32>
    %c1_i32 = arith.constant 1 : i32
    %12 = vector.broadcast %c1_i32 : i32 to vector<2x256xi32>
    %13 = arith.select %10, %12, %2 : vector<2x256xi1>, vector<2x256xi32>
    %c0_4 = arith.constant 0 : index
    %c2 = arith.constant 2 : index
    %c0_5 = arith.constant 0 : index
    %14 = vector.load %arg2[%c0_4, %c2, %c0_5] : memref<2x4x256xf32, #tpu.memory_space<vmem>>, vector<2x1x256xf32>
    %15 = vector.shape_cast %14 : vector<2x1x256xf32> to vector<2x256xf32>
    %16 = arith.cmpf ogt, %15, %11 : vector<2x256xf32>
    %17 = arith.cmpf one, %15, %15 : vector<2x256xf32>
    %18 = arith.cmpf one, %11, %11 : vector<2x256xf32>
    %cst_6 = arith.constant dense<true> : vector<2x256xi1>
    %19 = arith.xori %18, %cst_6 : vector<2x256xi1>
    %20 = arith.andi %17, %19 : vector<2x256xi1>
    %21 = arith.ori %16, %20 : vector<2x256xi1>
    %22 = arith.select %21, %15, %11 : vector<2x256xi1>, vector<2x256xf32>
    %c2_i32 = arith.constant 2 : i32
    %23 = vector.broadcast %c2_i32 : i32 to vector<2x256xi32>
    %24 = arith.select %21, %23, %13 : vector<2x256xi1>, vector<2x256xi32>
    %c0_7 = arith.constant 0 : index
    %c3 = arith.constant 3 : index
    %c0_8 = arith.constant 0 : index
    %25 = vector.load %arg2[%c0_7, %c3, %c0_8] : memref<2x4x256xf32, #tpu.memory_space<vmem>>, vector<2x1x256xf32>
    %26 = vector.shape_cast %25 : vector<2x1x256xf32> to vector<2x256xf32>
    %27 = arith.cmpf ogt, %26, %22 : vector<2x256xf32>
    %28 = arith.cmpf one, %26, %26 : vector<2x256xf32>
    %29 = arith.cmpf one, %22, %22 : vector<2x256xf32>
    %cst_9 = arith.constant dense<true> : vector<2x256xi1>
    %30 = arith.xori %29, %cst_9 : vector<2x256xi1>
    %31 = arith.andi %28, %30 : vector<2x256xi1>
    %32 = arith.ori %27, %31 : vector<2x256xi1>
    %c3_i32 = arith.constant 3 : i32
    %33 = vector.broadcast %c3_i32 : i32 to vector<2x256xi32>
    %34 = arith.select %32, %33, %24 : vector<2x256xi1>, vector<2x256xi32>
    %c0_10 = arith.constant 0 : index
    %c0_11 = arith.constant 0 : index
    %35 = vector.load %arg3[%c0_10, %c0_11] : memref<2x256xi32, #tpu.memory_space<vmem>>, vector<2x256xi32>
    tpu.vector_store %arg3[%c0_10, %c0_11], %34 {strides = array<i32>} : memref<2x256xi32, #tpu.memory_space<vmem>>, vector<2x256xi32>,
    return
  }
  func.func @transform_0(%arg0: i32, %arg1: i32) -> (i32, i32, i32) {
    %c0_i32 = arith.constant 0 : i32
    %c0_i32_0 = arith.constant 0 : i32
    return %arg0, %c0_i32, %arg1 : i32, i32, i32
  }
  func.func @transform_1(%arg0: i32, %arg1: i32) -> (i32, i32) {
    %c0_i32 = arith.constant 0 : i32
    return %arg0, %arg1 : i32, i32
  }
}

</mosaic_0001>

<bundles_post_ra>
// kernel: tpu_custom_call.1
= control target key start
LH: loop header
LB: loop body
LE: loop exit
PB: predicated region body
PF: predicated region fallthrough
CT: control target
= control target key end

     0   :  { %6 = vsyncpa [#allocation3], 0  ;;  %s241_s0 = inlined_call_operand.hbm [shape: f32[2,4,256], index: 0, kind: input, shape index: {}]   ;;  %s242_s1 = inlined_call_operand.hbm [shape: s32[2,256], index: 1, kind: output, shape index: {}]  }
   0x1   :  { %7 = vsyncpa [#allocation4], 0  ;;  %s163_s6 = smov [#allocation2]   ;;  %s115_s10 = scalar_lea.hbm %s241_s0, 256 }
   0x2   :  { %s13_s7 = sshll.u32 %s163_s6, 4  ;;  %p116_p0 = scmp.ne.s32.totalorder %s241_s0, %s115_s10  ;;  %s14_s7 = int_to_ptr.vmem [resolvable:$true] %s13_s7 }
   0x3   :  { %p119_p1 = scmp.lt.u32.totalorder %s115_s10, %s241_s0 }
   0x5   :  { %p121_p2 = pnand %p119_p1, %p116_p0 }
   0x7   :  { %124 = shalt.err (!%p121_p2)
}
   0x8   :  { %s125_s15 = scalar_lea.vmem %s14_s7, 256  ;;  %p130_p4 = scmp.lt.s32.totalorder %s14_s7, %s14_s7 }
   0x9   :  { %p126_p3 = scmp.ne.s32.totalorder %s14_s7, %s125_s15  ;;  %p131_p5 = scmp.lt.s32.totalorder %s125_s15, %s125_s15 }
   0xb   :  { %p132_p6 = por %p131_p5, %p130_p4 }
   0xd   :  { %p133_p7 = pnand %p132_p6, %p126_p3 }
   0xf   :  { %136 = shalt.err (!%p133_p7)
}
  0x10   :  { %s164_s16 = smov 128   ;;  %s165_s17 = smov 8  }
  0x11   :  { %19 = dma.hbm_to_vmem [thread:$0]  %s241_s0, 256, %s14_s7, [#allocation3], %s164_s16, %s164_s16, %s165_s17  }
  0x12   :  { %159 = dma.done.wait [#allocation3], 256  }
  0x13   :  { %160 = vsyncadd [#allocation3], 4294967040  ;;  %v23_v0 = vld [vmem:[#allocation2] ss:$4 sm:$0x3]  ;;  %vm166_vm4 = vmmov 1  }
  0x14   :  { %v25_v1 = vld [vmem:[#allocation2 + $0x8] ss:$4 sm:$0x3]  ;;  %v27_v2 = vld [vmem:[#allocation2 + $0x1] ss:$4 sm:$0x3]  ;;  %vm34_vm0 = vcmp.ne.f32.partialorder %v23_v0, %v23_v0 }
  0x15   :  { %v29_v3 = vld [vmem:[#allocation2 + $0x9] ss:$4 sm:$0x3]  ;;  %vm35_vm1 = vcmp.ne.f32.partialorder %v25_v1, %v25_v1  ;;  %vm32_vm2 = vcmp.ne.f32.partialorder %v27_v2, %v27_v2  ;;  %vm36_vm5 = vmxor %vm34_vm0, %vm166_vm4  ;;  %vm30_vm6 = vcmp.gt.f32.partialorder %v27_v2, %v23_v0  ;;  %v47_v4 = vld [vmem:[#allocation2 + $0x2] ss:$4 sm:$0x3] }
  0x16   :  { %vm33_vm3 = vcmp.ne.f32.partialorder %v29_v3, %v29_v3  ;;  %vm37_vm7 = vmxor %vm35_vm1, %vm166_vm4  ;;  %vm31_vm8 = vcmp.gt.f32.partialorder %v29_v3, %v25_v1  ;;  %v49_v6 = vld [vmem:[#allocation2 + $0xa] ss:$4 sm:$0x3]  ;;  %vm52_vm13 = vcmp.ne.f32.partialorder %v47_v4, %v47_v4  ;;  %v67_v10 = vld [vmem:[#allocation2 + $0x3] ss:$4 sm:$0x3] }
  0x17   :  { %vm38_vm9 = vmand %vm32_vm2, %vm36_vm5  ;;  %vm53_vm15 = vcmp.ne.f32.partialorder %v49_v6, %v49_v6  ;;  %v69_v12 = vld [vmem:[#allocation2 + $0xb] ss:$4 sm:$0x3]  ;;  %v167_v15 = vmov 0   ;;  %s168_s0 = smov [#allocation5]  }
  0x18   :  { %vm39_vm10 = vmand %vm33_vm3, %vm37_vm7  ;;  %s99_s20 = sshll.u32 %s168_s0, 4  ;;  %s100_s20 = int_to_ptr.vmem [resolvable:$true] %s99_s20 }
  0x19   :  { %vm193_vm11 = vmor %vm30_vm6, %vm38_vm9  ;;  %s137_s21 = scalar_lea.vmem %s100_s20, 64  ;;  %p142_p9 = scmp.lt.s32.totalorder %s100_s20, %s100_s20 }
  0x1a   :  { %vm197_vm12 = vmor %vm31_vm8, %vm39_vm10  ;;  %v42_v8 = vsel %vm193_vm11, %v27_v2, %v23_v0  ;;  %v44_v16 = vsel %vm193_vm11, 1, %v167_v15  ;;  %vm72_vm10 = vcmp.ne.f32.partialorder %v67_v10, %v67_v10  ;;  %p138_p8 = scmp.ne.s32.totalorder %s100_s20, %s137_s21  ;;  %p143_p10 = scmp.lt.s32.totalorder %s137_s21, %s137_s21 }
  0x1b   :  { %v43_v9 = vsel %vm197_vm12, %v29_v3, %v25_v1  ;;  %vm54_vm14 = vcmp.ne.f32.partialorder %v42_v8, %v42_v8  ;;  %vm50_vm2 = vcmp.gt.f32.partialorder %v47_v4, %v42_v8  ;;  %v45_v18 = vsel %vm197_vm12, 1, %v167_v15 }
  0x1c   :  { %vm55_vm0 = vcmp.ne.f32.partialorder %v43_v9, %v43_v9  ;;  %vm56_vm1 = vmxor %vm54_vm14, %vm166_vm4  ;;  %vm51_vm5 = vcmp.gt.f32.partialorder %v49_v6, %v43_v9  ;;  %vm73_vm14 = vcmp.ne.f32.partialorder %v69_v12, %v69_v12  ;;  %p144_p11 = por %p143_p10, %p142_p9 }
  0x1d   :  { %vm57_vm3 = vmxor %vm55_vm0, %vm166_vm4 }
  0x1e   :  { %vm58_vm6 = vmand %vm52_vm13, %vm56_vm1  ;;  %p145_p12 = pnand %p144_p11, %p138_p8 }
  0x1f   :  { %vm59_vm7 = vmand %vm53_vm15, %vm57_vm3 }
  0x20   :  { %vm207_vm8 = vmor %vm50_vm2, %vm58_vm6 }
  0x21   :  { %vm211_vm9 = vmor %vm51_vm5, %vm59_vm7  ;;  %v62_v14 = vsel %vm207_vm8, %v47_v4, %v42_v8  ;;  %v64_v19 = vsel %vm207_vm8, 2, %v44_v16 }
  0x22   :  { %v63_v17 = vsel %vm211_vm9, %v49_v6, %v43_v9  ;;  %vm74_vm13 = vcmp.ne.f32.partialorder %v62_v14, %v62_v14  ;;  %vm70_vm1 = vcmp.gt.f32.partialorder %v67_v10, %v62_v14  ;;  %v65_v20 = vsel %vm211_vm9, 2, %v45_v18 }
  0x23   :  { %vm75_vm15 = vcmp.ne.f32.partialorder %v63_v17, %v63_v17  ;;  %vm76_vm0 = vmxor %vm74_vm13, %vm166_vm4  ;;  %vm71_vm3 = vcmp.gt.f32.partialorder %v69_v12, %v63_v17 }
  0x24   :  { %vm77_vm2 = vmxor %vm75_vm15, %vm166_vm4 }
  0x25   :  { %vm78_vm11 = vmand %vm72_vm10, %vm76_vm0 }
  0x26   :  { %vm79_vm5 = vmand %vm73_vm14, %vm77_vm2 }
  0x27   :  { %vm80_vm6 = vmor %vm70_vm1, %vm78_vm11 }
  0x28   :  { %vm81_vm12 = vmor %vm71_vm3, %vm79_vm5  ;;  %v82_v21 = vsel %vm80_vm6, 3, %v64_v19 }
  0x29   :  { %v83_v22 = vsel %vm81_vm12, 3, %v65_v20 }
  0x2a   :  { %v84_v23 = vcombine.low %v82_v21, %v83_v22 }
  0x2c   :  { %108 = vst.sshfl [vmem:[#allocation5] sm:$0x33 pattern:$0x75316420] %v84_v23 }
  0x2d   :  { %148 = shalt.err (!%p145_p12)
}
  0x2e   :  { %s149_s24 = scalar_lea.hbm %s242_s1, 64 }
  0x2f   :  { %p150_p13 = scmp.ne.s32.totalorder %s242_s1, %s149_s24  ;;  %p153_p0 = scmp.lt.u32.totalorder %s149_s24, %s242_s1 }
  0x31   :  { %p155_p1 = pnand %p153_p0, %p150_p13 }
  0x33   :  { %158 = shalt.err (!%p155_p1)
}
  0x34   :  { %102 = dma.vmem_to_hbm [thread:$0]  %s100_s20, 64, %s242_s1, [#allocation4]  }
  0x35   :  { %161 = dma.done.wait [#allocation4], 64  }
  0x36   :  { %162 = vsyncadd [#allocation4], 4294967232 }
  0x37   :  { %106 = vsyncpa [#allocation3], 1 }
  0x38   :  { %107 = vsyncpa [#allocation4], 1 }

</bundles_post_ra>
